<compile_context>
chip_gen: v6e
topology: v6e:2x2x1
jax: 0.10.0
libtpu: 0.0.40
codegen_flags: <defaults>
</compile_context>

<pallas_src>
import jax
import jax.numpy as jnp
from jax.experimental import pallas as pl
from jax.experimental.pallas import tpu as pltpu

H1 = 250          # logical hidden sizes (match the PyTorch module)
H2 = 100
H1P = 256         # lane-dense padded hidden sizes (multiples of 128)
H2P = 128
_LANE = 128
_SUBLANE = 8


def _round_up(x, m):
    return (x + m - 1) // m * m


def _decoder_kernel(y_ref, w1_ref, b1_ref, w2_ref, b2_ref, w3_ref, b3_ref,
                    inv_temp_ref, out_ref):
    inv_temp = inv_temp_ref[0, 0]

    # input_fc + ReLU : bf16 operands -> MXU, f32 accumulate, f32 pointwise
    h = jnp.dot(y_ref[...], w1_ref[...], preferred_element_type=jnp.float32)
    h = jnp.maximum(h + b1_ref[...], 0.0)

    # hidden_fc + ReLU
    h = jnp.dot(h.astype(jnp.bfloat16), w2_ref[...],
                preferred_element_type=jnp.float32)
    h = jnp.maximum(h + b2_ref[...], 0.0)

    # linear + sigmoid(logits * inv_temp)
    logits = jnp.dot(h.astype(jnp.bfloat16), w3_ref[...],
                     preferred_element_type=jnp.float32) + b3_ref[...]
    out_ref[...] = jax.nn.sigmoid(logits * inv_temp).astype(out_ref.dtype)


def prepare_params(params):
    """One-time layout/dtype prep (call once, NOT per forward):
       weights (in,out) zero-padded to lane-dense shapes and cast to bf16,
       biases zero-padded f32 (1,N) rows."""
    y_size = params["w1"].shape[0]
    a_size = params["w3"].shape[1]
    a_pad = _round_up(a_size, _LANE)

    def pad_w(w, rows, cols):
        return jnp.pad(w, ((0, rows - w.shape[0]),
                           (0, cols - w.shape[1]))).astype(jnp.bfloat16)

    def pad_b(b, n):
        b = b.reshape(1, -1).astype(jnp.float32)
        return jnp.pad(b, ((0, 0), (0, n - b.shape[1])))

    return {
        "y_size": y_size,
        "a_size": a_size,
        "a_pad": a_pad,
        "w1": pad_w(params["w1"], y_size, H1P),
        "b1": pad_b(params["b1"], H1P),
        "w2": pad_w(params["w2"], H1P, H2P),
        "b2": pad_b(params["b2"], H2P),
        "w3": pad_w(params["w3"], H2P, a_pad),
        "b3": pad_b(params["b3"], a_pad),
    }


def decoder_net_forward(y, prep, temp=1.0, block_m=128):
    """Forward pass of decoder_Net using prepared (padded, bf16) params."""
    y_size = prep["y_size"]
    a_size = prep["a_size"]
    a_pad = prep["a_pad"]

    y2d = y.reshape(-1, y_size)
    B = y2d.shape[0]

    # Batch tiling: tm multiple of 8 (sublane); weights resident across tiles.
    if B <= block_m:
        tm = max(_SUBLANE, _round_up(B, _SUBLANE))
        b_pad = tm
    else:
        tm = block_m
        b_pad = _round_up(B, tm)

    y2d = y2d.astype(jnp.bfloat16)
    if b_pad != B:
        y2d = jnp.pad(y2d, ((0, b_pad - B), (0, 0)))

    inv_temp = jnp.array([[1.0 / float(temp)]], dtype=jnp.float32)

    out = pl.pallas_call(
        _decoder_kernel,
        out_shape=jax.ShapeDtypeStruct((b_pad, a_pad), jnp.float32),
        grid=(b_pad // tm,),
        in_specs=[
            pl.BlockSpec((tm, y_size), lambda i: (i, 0)),     # y tile
            pl.BlockSpec((y_size, H1P), lambda i: (0, 0)),    # w1 (resident)
            pl.BlockSpec((1, H1P), lambda i: (0, 0)),         # b1
            pl.BlockSpec((H1P, H2P), lambda i: (0, 0)),       # w2
            pl.BlockSpec((1, H2P), lambda i: (0, 0)),         # b2
            pl.BlockSpec((H2P, a_pad), lambda i: (0, 0)),     # w3
            pl.BlockSpec((1, a_pad), lambda i: (0, 0)),       # b3
            pl.BlockSpec(memory_space=pltpu.SMEM),            # inv_temp scalar
        ],
        out_specs=pl.BlockSpec((tm, a_pad), lambda i: (i, 0)),
        compiler_params=pltpu.CompilerParams(
            dimension_semantics=("parallel",)),
    )(y2d, prep["w1"], prep["b1"], prep["w2"], prep["b2"],
      prep["w3"], prep["b3"], inv_temp)

    # Slice off batch padding and lane padding outside the kernel.
    return out[:B, :a_size]


def init_params(key, y_size, a_size):
    """PyTorch nn.Linear-style init; weights stored transposed as (in, out)."""
    keys = jax.random.split(key, 6)

    def lin(kw, kb, fan_in, fan_out):
        bound = 1.0 / jnp.sqrt(jnp.float32(fan_in))
        w = jax.random.uniform(kw, (fan_in, fan_out), jnp.float32, -bound, bound)
        b = jax.random.uniform(kb, (fan_out,), jnp.float32, -bound, bound)
        return w, b

    w1, b1 = lin(keys[0], keys[1], y_size, H1)
    w2, b2 = lin(keys[2], keys[3], H1, H2)
    w3, b3 = lin(keys[4], keys[5], H2, a_size)
    return {"w1": w1, "b1": b1, "w2": w2, "b2": b2, "w3": w3, "b3": b3}


def _reference(y, params, temp=1.0, matmul_dtype=jnp.float32):
    """Pure-JAX reference. matmul_dtype=bf16 mimics the kernel's MXU numerics."""
    y_size = params["w1"].shape[0]

    def lin(x, w, b):
        return jnp.dot(x.astype(matmul_dtype), w.astype(matmul_dtype),
                       preferred_element_type=jnp.float32) + b

    h = y.reshape(-1, y_size).astype(jnp.float32)
    h = jnp.maximum(lin(h, params["w1"], params["b1"]), 0.0)
    h = jnp.maximum(lin(h, params["w2"], params["b2"]), 0.0)
    return jax.nn.sigmoid(lin(h, params["w3"], params["b3"]) / temp)


if __name__ == "__main__":
    key = jax.random.PRNGKey(0)
    k_in, k_par = jax.random.split(key)

    y_size = 32   # decoder input feature size
    a_size = 8    # decoder output size
    batch = 2

    y = jax.random.normal(k_in, (batch, y_size), dtype=jnp.float32)
    params = init_params(k_par, y_size, a_size)
    prep = prepare_params(params)   # one-time layout/dtype prep

    out = decoder_net_forward(y, prep, temp=1.0)
    out = jax.block_until_ready(out)
    assert out.shape == (batch, a_size)

    # Tight check vs a reference with the same bf16-operand / f32-accumulate
    # matmul numerics as the kernel.
    ref_bf16 = _reference(y, params, temp=1.0, matmul_dtype=jnp.bfloat16)
    assert jnp.allclose(out, ref_bf16, atol=1e-4, rtol=1e-4), \
        "mismatch vs bf16-semantics reference"

    # Sanity check vs the full-f32 PyTorch-equivalent math.
    ref_f32 = _reference(y, params, temp=1.0, matmul_dtype=jnp.float32)
    assert jnp.allclose(out, ref_f32, atol=3e-2, rtol=3e-2), \
        "mismatch vs f32 reference"

    print("KERNEL_OK")
</pallas_src>

<mosaic_0001>
module attributes {stable_mosaic.version = 11 : i64} {
  func.func @_decoder_kernel(%arg0: i32, %arg1: memref<8x32xbf16, #tpu.memory_space<vmem>>, %arg2: memref<32x256xbf16, #tpu.memory_space<vmem>>, %arg3: memref<1x256xf32, #tpu.memory_space<vmem>>, %arg4: memref<256x128xbf16, #tpu.memory_space<vmem>>, %arg5: memref<1x128xf32, #tpu.memory_space<vmem>>, %arg6: memref<128x128xbf16, #tpu.memory_space<vmem>>, %arg7: memref<1x128xf32, #tpu.memory_space<vmem>>, %arg8: memref<1x1xf32, #tpu.memory_space<smem>>, %arg9: memref<8x128xf32, #tpu.memory_space<vmem>>) attributes {dimension_semantics = [#tpu.dimension_semantics<parallel>], iteration_bounds = array<i64: 1>, scalar_prefetch = 0 : i64, scratch_operands = 0 : i64, tpu.core_type = #tpu.core_type<tc>, window_params = [{transform_indices = @transform_0, window_bounds = array<i64: 8, 32>}, {pipeline_mode = #tpu.pipeline_mode<synchronous>, transform_indices = @transform_1, window_bounds = array<i64: 32, 256>}, {pipeline_mode = #tpu.pipeline_mode<synchronous>, transform_indices = @transform_2, window_bounds = array<i64: 1, 256>}, {pipeline_mode = #tpu.pipeline_mode<synchronous>, transform_indices = @transform_3, window_bounds = array<i64: 256, 128>}, {pipeline_mode = #tpu.pipeline_mode<synchronous>, transform_indices = @transform_4, window_bounds = array<i64: 1, 128>}, {pipeline_mode = #tpu.pipeline_mode<synchronous>, transform_indices = @transform_5, window_bounds = array<i64: 128, 128>}, {pipeline_mode = #tpu.pipeline_mode<synchronous>, transform_indices = @transform_6, window_bounds = array<i64: 1, 128>}, {transform_indices = @transform_7, window_bounds = array<i64: 1, 1>}, {transform_indices = @transform_8, window_bounds = array<i64: 8, 128>}]} {
    %c0 = arith.constant 0 : index
    %c0_0 = arith.constant 0 : index
    %0 = memref.load %arg8[%c0, %c0_0] : memref<1x1xf32, #tpu.memory_space<smem>>
    %c0_1 = arith.constant 0 : index
    %c0_2 = arith.constant 0 : index
    %1 = vector.load %arg1[%c0_1, %c0_2] : memref<8x32xbf16, #tpu.memory_space<vmem>>, vector<8x32xbf16>
    %c0_3 = arith.constant 0 : index
    %c0_4 = arith.constant 0 : index
    %2 = vector.load %arg2[%c0_3, %c0_4] : memref<32x256xbf16, #tpu.memory_space<vmem>>, vector<32x256xbf16>
    %cst = arith.constant dense<0.000000e+00> : vector<8x256xf32>
    %3 = tpu.matmul %1, %2, %cst {dimension_numbers = #tpu.dot_dimension_numbers<[1], [0], [0], [1], [0, 0, 1, 1], [], []>} : vector<8x32xbf16>, vector<32x256xbf16>, vector<8x256xf32> -> vector<8x256xf32>
    %c0_5 = arith.constant 0 : index
    %c0_6 = arith.constant 0 : index
    %4 = vector.load %arg3[%c0_5, %c0_6] : memref<1x256xf32, #tpu.memory_space<vmem>>, vector<1x256xf32>
    %5 = vector.broadcast %4 : vector<1x256xf32> to vector<8x256xf32>
    %6 = arith.addf %3, %5 : vector<8x256xf32>
    %cst_7 = arith.constant 0.000000e+00 : f32
    %7 = vector.broadcast %cst_7 : f32 to vector<8x256xf32>
    %8 = arith.maximumf %6, %7 : vector<8x256xf32>
    %9 = arith.truncf %8 : vector<8x256xf32> to vector<8x256xbf16>
    %c0_8 = arith.constant 0 : index
    %c0_9 = arith.constant 0 : index
    %10 = vector.load %arg4[%c0_8, %c0_9] : memref<256x128xbf16, #tpu.memory_space<vmem>>, vector<256x128xbf16>
    %cst_10 = arith.constant dense<0.000000e+00> : vector<8x128xf32>
    %11 = tpu.matmul %9, %10, %cst_10 {dimension_numbers = #tpu.dot_dimension_numbers<[1], [0], [0], [1], [0, 0, 1, 1], [], []>} : vector<8x256xbf16>, vector<256x128xbf16>, vector<8x128xf32> -> vector<8x128xf32>
    %c0_11 = arith.constant 0 : index
    %c0_12 = arith.constant 0 : index
    %12 = vector.load %arg5[%c0_11, %c0_12] : memref<1x128xf32, #tpu.memory_space<vmem>>, vector<1x128xf32>
    %13 = vector.broadcast %12 : vector<1x128xf32> to vector<8x128xf32>
    %14 = arith.addf %11, %13 : vector<8x128xf32>
    %cst_13 = arith.constant 0.000000e+00 : f32
    %15 = vector.broadcast %cst_13 : f32 to vector<8x128xf32>
    %16 = arith.maximumf %14, %15 : vector<8x128xf32>
    %17 = arith.truncf %16 : vector<8x128xf32> to vector<8x128xbf16>
    %c0_14 = arith.constant 0 : index
    %c0_15 = arith.constant 0 : index
    %18 = vector.load %arg6[%c0_14, %c0_15] : memref<128x128xbf16, #tpu.memory_space<vmem>>, vector<128x128xbf16>
    %cst_16 = arith.constant dense<0.000000e+00> : vector<8x128xf32>
    %19 = tpu.matmul %17, %18, %cst_16 {dimension_numbers = #tpu.dot_dimension_numbers<[1], [0], [0], [1], [0, 0, 1, 1], [], []>} : vector<8x128xbf16>, vector<128x128xbf16>, vector<8x128xf32> -> vector<8x128xf32>
    %c0_17 = arith.constant 0 : index
    %c0_18 = arith.constant 0 : index
    %20 = vector.load %arg7[%c0_17, %c0_18] : memref<1x128xf32, #tpu.memory_space<vmem>>, vector<1x128xf32>
    %21 = vector.broadcast %20 : vector<1x128xf32> to vector<8x128xf32>
    %22 = arith.addf %19, %21 : vector<8x128xf32>
    %23 = vector.broadcast %0 : f32 to vector<8x128xf32>
    %24 = arith.mulf %22, %23 : vector<8x128xf32>
    %25 = arith.negf %24 : vector<8x128xf32>
    %26 = math.exp %25 : vector<8x128xf32>
    %cst_19 = arith.constant 1.000000e+00 : f32
    %27 = vector.broadcast %cst_19 : f32 to vector<8x128xf32>
    %28 = arith.addf %27, %26 : vector<8x128xf32>
    %29 = arith.divf %27, %28 : vector<8x128xf32>
    %c0_20 = arith.constant 0 : index
    %c0_21 = arith.constant 0 : index
    %30 = vector.load %arg9[%c0_20, %c0_21] : memref<8x128xf32, #tpu.memory_space<vmem>>, vector<8x128xf32>
    tpu.vector_store %arg9[%c0_20, %c0_21], %29 {strides = array<i32>} : memref<8x128xf32, #tpu.memory_space<vmem>>, vector<8x128xf32>,
    return
  }
  func.func @transform_0(%arg0: i32) -> (i32, i32) {
    %c0_i32 = arith.constant 0 : i32
    %c0_i32_0 = arith.constant 0 : i32
    return %arg0, %c0_i32 : i32, i32
  }
  func.func @transform_1(%arg0: i32) -> (i32, i32) {
    %c0_i32 = arith.constant 0 : i32
    %c0_i32_0 = arith.constant 0 : i32
    %c0_i32_1 = arith.constant 0 : i32
    return %c0_i32, %c0_i32_0 : i32, i32
  }
  func.func @transform_2(%arg0: i32) -> (i32, i32) {
    %c0_i32 = arith.constant 0 : i32
    %c0_i32_0 = arith.constant 0 : i32
    %c0_i32_1 = arith.constant 0 : i32
    return %c0_i32, %c0_i32_0 : i32, i32
  }
  func.func @transform_3(%arg0: i32) -> (i32, i32) {
    %c0_i32 = arith.constant 0 : i32
    %c0_i32_0 = arith.constant 0 : i32
    %c0_i32_1 = arith.constant 0 : i32
    return %c0_i32, %c0_i32_0 : i32, i32
  }
  func.func @transform_4(%arg0: i32) -> (i32, i32) {
    %c0_i32 = arith.constant 0 : i32
    %c0_i32_0 = arith.constant 0 : i32
    %c0_i32_1 = arith.constant 0 : i32
    return %c0_i32, %c0_i32_0 : i32, i32
  }
  func.func @transform_5(%arg0: i32) -> (i32, i32) {
    %c0_i32 = arith.constant 0 : i32
    %c0_i32_0 = arith.constant 0 : i32
    %c0_i32_1 = arith.constant 0 : i32
    return %c0_i32, %c0_i32_0 : i32, i32
  }
  func.func @transform_6(%arg0: i32) -> (i32, i32) {
    %c0_i32 = arith.constant 0 : i32
    %c0_i32_0 = arith.constant 0 : i32
    %c0_i32_1 = arith.constant 0 : i32
    return %c0_i32, %c0_i32_0 : i32, i32
  }
  func.func @transform_7(%arg0: i32) -> (i32, i32) {
    %c0_i32 = arith.constant 0 : i32
    %c0_i32_0 = arith.constant 0 : i32
    %c0_i32_1 = arith.constant 0 : i32
    return %c0_i32, %c0_i32_0 : i32, i32
  }
  func.func @transform_8(%arg0: i32) -> (i32, i32) {
    %c0_i32 = arith.constant 0 : i32
    %c0_i32_0 = arith.constant 0 : i32
    return %arg0, %c0_i32 : i32, i32
  }
}

</mosaic_0001>

<bundles_post_ra>
// kernel: tpu_custom_call.1
= control target key start
LH: loop header
LB: loop body
LE: loop exit
PB: predicated region body
PF: predicated region fallthrough
CT: control target
= control target key end

     0   :  { %14 = vsyncpa [#allocation4], 0  ;;  %s807_s0 = inlined_call_operand.hbm [shape: bf16[8,32], index: 0, kind: input, shape index: {}]   ;;  %s808_s1 = inlined_call_operand.hbm [shape: bf16[32,256], index: 1, kind: input, shape index: {}]   ;;  %s809_s2 = inlined_call_operand.vmem [shape: f32[1,256], index: 2, kind: input, shape index: {}]   ;;  %s810_s3 = inlined_call_operand.hbm [shape: bf16[256,128], index: 3, kind: input, shape index: {}]   ;;  %s811_s4 = inlined_call_operand.vmem [shape: f32[1,128], index: 4, kind: input, shape index: {}]   ;;  %s812_s5 = inlined_call_operand.hbm [shape: bf16[128,128], index: 5, kind: input, shape index: {}]   ;;  %s813_s6 = inlined_call_operand.vmem [shape: f32[1,128], index: 6, kind: input, shape index: {}]   ;;  %s814_s7 = inlined_call_operand.<no memory space> [shape: f32[1,1], index: 7, kind: input, shape index: {}]   ;;  %s815_s8 = inlined_call_operand.hbm [shape: f32[8,128], index: 8, kind: output, shape index: {}]  }
   0x1   :  { %15 = vsyncpa [#allocation7], 0 }
   0x2   :  { %16 = vsyncpa [#allocation10], 0 }
   0x3   :  { %17 = vsyncpa [#allocation5], 0  ;;  %s723_s27 = smov [#allocation6]  }
   0x4   :  { %s33_s28 = sshll.u32 %s723_s27, 4  ;;  %s34_s28 = int_to_ptr.vmem [resolvable:$true] %s33_s28 }
   0x5   :  { %s623_s29 = scalar_lea.vmem %s34_s28, 512  ;;  %p628_p1 = scmp.lt.s32.totalorder %s34_s28, %s34_s28 }
   0x6   :  { %p624_p0 = scmp.ne.s32.totalorder %s34_s28, %s623_s29  ;;  %p629_p2 = scmp.lt.s32.totalorder %s623_s29, %s623_s29 }
   0x8   :  { %p630_p3 = por %p629_p2, %p628_p1 }
   0xa   :  { %p631_p4 = pnand %p630_p3, %p624_p0 }
   0xc   :  { %634 = shalt.err (!%p631_p4)
}
   0xd   :  { %s724_s30 = smov 128   ;;  %s725_s9 = smov 8  }
   0xe   :  { %39 = dma.hbm_to_vmem [thread:$0]  %s808_s1, 512, %s34_s28, [#allocation7], %s724_s30, %s724_s30, %s725_s9  }
   0xf   :  { %s726_s12 = smov [#allocation3]   ;;  %s727_s14 = smov [#allocation8]  }
  0x10   :  { %s24_s13 = sshll.u32 %s726_s12, 4  ;;  %s47_s15 = sshll.u32 %s727_s14, 4  ;;  %s25_s13 = int_to_ptr.vmem [resolvable:$true] %s24_s13  ;;  %s48_s15 = int_to_ptr.vmem [resolvable:$true] %s47_s15 }
  0x11   :  { %s643_s16 = scalar_lea.vmem %s25_s13, 64  ;;  %p648_p6 = scmp.lt.s32.totalorder %s25_s13, %s25_s13 }
  0x12   :  { %p644_p5 = scmp.ne.s32.totalorder %s25_s13, %s643_s16  ;;  %p649_p7 = scmp.lt.s32.totalorder %s643_s16, %s643_s16 }
  0x14   :  { %p650_p8 = por %p649_p7, %p648_p6 }
  0x16   :  { %p651_p9 = pnand %p650_p8, %p644_p5 }
  0x18   :  { %654 = shalt.err (!%p651_p9)
}
  0x19   :  { %27 = dma.hbm_to_vmem [thread:$0]  %s807_s0, 64, %s25_s13, [#allocation4]  }
  0x1a   :  { %s663_s19 = scalar_lea.vmem %s48_s15, 2048  ;;  %p668_p11 = scmp.lt.s32.totalorder %s48_s15, %s48_s15 }
  0x1b   :  { %p664_p10 = scmp.ne.s32.totalorder %s48_s15, %s663_s19  ;;  %p669_p12 = scmp.lt.s32.totalorder %s663_s19, %s663_s19 }
  0x1d   :  { %p670_p13 = por %p669_p12, %p668_p11 }
  0x1f   :  { %p671_p0 = pnand %p670_p13, %p664_p10 }
  0x21   :  { %674 = shalt.err (!%p671_p0)
}
  0x22   :  { %s728_s1 = smov 64   ;;  %s729_s20 = smov 4  }
  0x23   :  { %53 = dma.hbm_to_vmem [thread:$0]  %s810_s3, 2048, %s48_s15, [#allocation7], %s728_s1, %s728_s1, %s729_s20  }
  0x24   :  { %s730_s23 = smov [#allocation9]  }
  0x25   :  { %s61_s24 = sshll.u32 %s730_s23, 4  ;;  %s62_s24 = int_to_ptr.vmem [resolvable:$true] %s61_s24 }
  0x26   :  { %s683_s25 = scalar_lea.vmem %s62_s24, 1024  ;;  %p688_p2 = scmp.lt.s32.totalorder %s62_s24, %s62_s24 }
  0x27   :  { %p684_p1 = scmp.ne.s32.totalorder %s62_s24, %s683_s25  ;;  %p689_p3 = scmp.lt.s32.totalorder %s683_s25, %s683_s25 }
  0x29   :  { %p690_p4 = por %p689_p3, %p688_p2 }
  0x2b   :  { %p691_p5 = pnand %p690_p4, %p684_p1 }
  0x2d   :  { %694 = shalt.err (!%p691_p5)
}
  0x2e   :  { %67 = dma.hbm_to_vmem [thread:$0]  %s812_s5, 1024, %s62_s24, [#allocation10], %s728_s1, %s728_s1, %s729_s20  }
  0x2f   :  { %715 = dma.done.wait [#allocation4], 64  }
  0x30   :  { %716 = vsyncadd [#allocation4], 4294967232 }
  0x31   :  { %717 = dma.done.wait [#allocation7], 2560  }
  0x32   :  { %718 = vsyncadd [#allocation7], 4294964736 }
  0x33   :  { %719 = dma.done.wait [#allocation10], 1024  }
  0x34   :  { %720 = vsyncadd [#allocation10], 4294966272  ;;  %v731_v0 = vmov 0   ;;  %v581_v1 = vld [vmem:[#allocation6 + $0x14] ss:$8 sps:$4 sm:$0xff]   ;;  %vm123_vm0 = vcmask 261120   ;;  %v93_v28 = vlaneseq  ;;  %v460_v59 = vstv %s814_s7 }
  0x35   :  { %159 = vmatprep.mubr.bf16.mxu0 %v731_v0  ;;  %v583_v2 = vld [vmem:[#allocation6 + $0x10] ss:$8 sps:$4 sm:$0xff]   ;;  %139 = vmatprep.subr.bf16.mxu0 %v581_v1  ;;  %v584_v3 = vld [vmem:[#allocation6 + $0x4] ss:$8 sps:$4 sm:$0xff]   ;;  %v586_v4 = vld [vmem:[#allocation6] ss:$8 sps:$4 sm:$0xff]  }
  0x36   :  { %140 = vmatpush1.bf16.msra.mxu0 %v583_v2  ;;  %v587_v5 = vld [vmem:[#allocation8 + $0x78] sm:$0xff]   ;;  %v589_v8 = vld [vmem:[#allocation8 + $0x70] sm:$0xff]   ;;  %v591_v10 = vld [vmem:[#allocation8 + $0x68] sm:$0xff]   ;;  %v732_v23 = vmov 0.0   ;;  %v94_v29 = vshrl.u32 %v93_v28, 7  ;;  %vm733_vm1 = vmmov 0  }
  0x37   :  { %141 = vmatprep.subr.bf16.mxu0 %v584_v3  ;;  %v588_v6 = vld [vmem:[#allocation8 + $0x38] sm:$0xff]   ;;  %518 = vmatprep.subr.bf16.mxu1 %v587_v5  ;;  %v590_v9 = vld [vmem:[#allocation8 + $0x30] sm:$0xff]   ;;  %v592_v11 = vld [vmem:[#allocation8 + $0x28] sm:$0xff]  }
  0x38   :  { %v86_v7 = vld [vmem:[#allocation3] sm:$0xf]  ;;  %519 = vmatpush3.bf16.msra.mxu1 %v588_v6  ;;  %v593_v12 = vld [vmem:[#allocation8 + $0x60] sm:$0xff]   ;;  %v597_v16 = vld [vmem:[#allocation8 + $0x50] sm:$0xff]   ;;  %v95_v30 = vsub.s32 0, %v94_v29  ;;  %v99_v32 = vsub.s32 1, %v94_v29 }
  0x39   :  { %520 = vmatprep.subr.bf16.mxu1 %v589_v8  ;;  %v594_v13 = vld [vmem:[#allocation8 + $0x20] sm:$0xff]   ;;  %v595_v14 = vld [vmem:[#allocation8 + $0x58] sm:$0xff]   ;;  %v598_v17 = vld [vmem:[#allocation8 + $0x10] sm:$0xff]  }
  0x3a   :  { %142 = vmatpush1.bf16.msra.mxu0 %v586_v4  ;;  %v596_v15 = vld [vmem:[#allocation8 + $0x18] sm:$0xff]   ;;  %v599_v18 = vld [vmem:[#allocation8 + $0x48] sm:$0xff]   ;;  %v601_v20 = vld [vmem:[#allocation8 + $0x40] sm:$0xff]  }
  0x3b   :  { %v600_v19 = vld [vmem:[#allocation8 + $0x8] sm:$0xff]   ;;  %v602_v21 = vld [vmem:[#allocation8] sm:$0xff]   ;;  %v603_v22 = vld [vmem:[#allocation9 + $0x38] sm:$0xff]   ;;  %549 = vmatprep.subr.bf16.mxu0 %v732_v23 }
  0x3c   :  { %521 = vmatpush3.bf16.msra.mxu1 %v590_v9  ;;  %v604_v24 = vld [vmem:[#allocation9 + $0x30] sm:$0xff]   ;;  %v605_v25 = vld [vmem:[#allocation9 + $0x28] sm:$0xff]   ;;  %v606_v26 = vld [vmem:[#allocation9 + $0x20] sm:$0xff]  }
  0x3d   :  { %490 = vmatmul.mubr.msk.bf16.vlgmr.msra.gmra.mxu0 %vm123_vm0, %v86_v7  ;;  %522 = vmatprep.subr.bf16.mxu1 %v591_v10  ;;  %v607_v27 = vld [vmem:[#allocation9 + $0x18] sm:$0xff]   ;;  %v608_v45 = vld [vmem:[#allocation9 + $0x10] sm:$0xff]   ;;  %v609_v46 = vld [vmem:[#allocation9 + $0x8] sm:$0xff]  }
  0x3e   :  { %550 = vmatpush3.bf16.msra.mxu0 %v603_v22  ;;  %v91_v31 = vld [vmem:[%s809_s2] sm:$0x3]  ;;  %v610_v47 = vld [vmem:[#allocation9] sm:$0xff]   ;;  %565 = vmatprep.mubr.msk.bf16.mxu0 %vm733_vm1, %v732_v23 }
  0x3f   :  { %551 = vmatprep.subr.bf16.mxu0 %v732_v23  ;;  %v96_v33 = vrot.slane %v91_v31, %v95_v30  ;;  %v100_v34 = vrot.slane %v91_v31, %v99_v32  ;;  %v491_v49 = vld [vmem:[%s811_s4] ss:$0 sm:$0xff]  ;;  %s734_s4 = smov [#allocation11]  }
  0x40   :  { %523 = vmatpush3.bf16.msra.mxu1 %v592_v11  ;;  %v508_v57 = vld [vmem:[%s813_s6] ss:$0 sm:$0xff]  ;;  %s475_s10 = sshll.u32 %s734_s4, 4  ;;  %s476_s10 = int_to_ptr.vmem [resolvable:$true] %s475_s10 }
  0x41   :  { %524 = vmatprep.subr.bf16.mxu1 %v593_v12  ;;  %s695_s6 = scalar_lea.vmem %s476_s10, 128  ;;  %p700_p7 = scmp.lt.s32.totalorder %s476_s10, %s476_s10 }
  0x42   :  { %552 = vmatpush3.bf16.msra.mxu0 %v604_v24  ;;  %p696_p6 = scmp.ne.s32.totalorder %s476_s10, %s695_s6  ;;  %p701_p8 = scmp.lt.s32.totalorder %s695_s6, %s695_s6 }
  0x43   :  { %553 = vmatprep.subr.bf16.mxu0 %v732_v23 }
  0x44   :  { %525 = vmatpush3.bf16.msra.mxu1 %v594_v13  ;;  %p702_p9 = por %p701_p8, %p700_p7 }
  0x45   :  { %526 = vmatprep.subr.bf16.mxu1 %v595_v14 }
  0x46   :  { %554 = vmatpush3.bf16.msra.mxu0 %v605_v25  ;;  %p703_p10 = pnand %p702_p9, %p696_p6 }
  0x47   :  { %555 = vmatprep.subr.bf16.mxu0 %v732_v23 }
  0x48   :  { %527 = vmatpush3.bf16.msra.mxu1 %v596_v15 }
  0x49   :  { %528 = vmatprep.subr.bf16.mxu1 %v597_v16 }
  0x4a   :  { %556 = vmatpush3.bf16.msra.mxu0 %v606_v26 }
  0x4b   :  { %557 = vmatprep.subr.bf16.mxu0 %v732_v23 }
  0x4c   :  { %529 = vmatpush3.bf16.msra.mxu1 %v598_v17 }
  0x4d   :  { %530 = vmatprep.subr.bf16.mxu1 %v599_v18 }
  0x4e   :  { %558 = vmatpush3.bf16.msra.mxu0 %v607_v27 }
  0x4f   :  { %559 = vmatprep.subr.bf16.mxu0 %v732_v23 }
  0x50   :  { %531 = vmatpush3.bf16.msra.mxu1 %v600_v19 }
  0x51   :  { %532 = vmatprep.subr.bf16.mxu1 %v601_v20 }
  0x52   :  { %560 = vmatpush3.bf16.msra.mxu0 %v608_v45 }
  0x53   :  { %561 = vmatprep.subr.bf16.mxu0 %v732_v23 }
  0x54   :  { %533 = vmatpush3.bf16.msra.mxu1 %v602_v21 }
  0x56   :  { %562 = vmatpush3.bf16.msra.mxu0 %v609_v46 }
  0x57   :  { %563 = vmatprep.subr.bf16.mxu0 %v732_v23 }
  0x5a   :  { %564 = vmatpush3.bf16.msra.mxu0 %v610_v47 }
  0xfd   :  { %v161_v35 = vpop.f32.mrf.mxu0 }
  0xfe   :  { %v162_v36 = vadd.f32 %v161_v35, %v96_v33 }
  0xff   :  { %v163_v37 = vpop.f32.mrf.mxu0 }
 0x100   :  { %v164_v38 = vadd.f32 %v163_v37, %v100_v34  ;;  %v168_v39 = vmax.f32 %v162_v36, 0.0 }
 0x101   :  { %v165_v40 = vpop.f32.mrf.mxu0 }
 0x102   :  { %v169_v41 = vmax.f32 %v164_v38, 0.0  ;;  %v170_v44 = vpack.c.bf16 %v168_v39, %v168_v39 }
 0x103   :  { %v166_v42 = vpop.f32.mrf.mxu0 }
 0x104   :  { %v171_v43 = vpack.c.bf16 %v169_v41, %v169_v41 }
 0x106   :  { %339 = vmatprep.mubr.bf16.mxu1 %v171_v43 }
 0x107   :  { %340 = vmatmul.mubr.bf16.vlgmr.msra.gmra.mxu1 %v170_v44 }
 0x1c7   :  { %v534_v48 = vpop.f32.mrf.mxu1 }
 0x1c9   :  { %v535_v50 = vpop.f32.mrf.mxu1 }
 0x1ca   :  { %v536_v51 = vadd.f32 %v535_v50, %v534_v48 }
 0x1cb   :  { %v537_v52 = vpop.f32.mrf.mxu1 }
 0x1cc   :  { %v342_v53 = vadd.f32 %v536_v51, %v491_v49 }
 0x1cd   :  { %v538_v54 = vpop.f32.mrf.mxu1 }
 0x1ce   :  { %v347_v55 = vmax.f32 %v342_v53, 0.0 }
 0x1d0   :  { %v348_v56 = vpack.c.bf16 %v347_v55, %v347_v55 }
 0x1d2   :  { %566 = vmatmul.mubr.bf16.vlgmr.msra.gmra.mxu0 %v348_v56 }
 0x292   :  { %v454_v58 = vpop.f32.mrf.mxu0 }
 0x293   :  { %v455_v60 = vadd.f32 %v508_v57, %v454_v58 }
 0x294   :  { %v567_v61 = vpop.f32.mrf.mxu0 }
 0x295   :  { %v461_v62 = vmul.f32 %v460_v59, %v455_v60 }
 0x296   :  { %v457_v63 = vpop.f32.mrf.mxu0 }
 0x297   :  { %v517_v0 = vmul.f32 -1.442695, %v461_v62 }
 0x298   :  { %v568_v1 = vpop.f32.mrf.mxu0 }
 0x299   :  { %611 = vpow2.f32 %v517_v0 }
 0x2a6   :  { %v612_v2 = vpop.eup %611 }
 0x2a7   :  { %v465_v3 = vadd.f32 1.0, %v612_v2 }
 0x2a9   :  { %613 = vrcp.f32 %v465_v3 }
 0x2b6   :  { %v614_v4 = vpop.eup %613 }
 0x2b7   :  { %468 = vst [vmem:[#allocation11] sm:$0xff] %v614_v4 }
 0x2b8   :  { %706 = shalt.err (!%p703_p10)
}
 0x2b9   :  { %478 = dma.vmem_to_hbm [thread:$0]  %s476_s10, 128, %s815_s8, [#allocation5]  }
 0x2ba   :  { %721 = dma.done.wait [#allocation5], 128  }
 0x2bb   :  { %722 = vsyncadd [#allocation5], 4294967168 }
 0x2bc   :  { %482 = vsyncpa [#allocation4], 1 }
 0x2bd   :  { %483 = vsyncpa [#allocation7], 1 }
 0x2be   :  { %484 = vsyncpa [#allocation10], 1 }
 0x2bf   :  { %485 = vsyncpa [#allocation5], 1 }

</bundles_post_ra>
